<compile_context>
chip_gen: v6e
topology: v6e:2x2x1
jax: 0.10.0
libtpu: 0.0.40
codegen_flags: <defaults>
</compile_context>

<pallas_src>
import functools

import jax
import jax.numpy as jnp
from jax import lax
from jax.experimental import pallas as pl
from jax.experimental.pallas import tpu as pltpu


def _round_up(x: int, m: int) -> int:
    return ((x + m - 1) // m) * m


def _vmem_capacity_bytes() -> int:
    """Physical VMEM per TensorCore, with conservative fallbacks."""
    try:
        cap = int(getattr(pltpu.get_tpu_info(), "vmem_capacity_bytes"))
        if cap > 0:
            return cap
    except Exception:
        pass
    try:
        kind = jax.devices()[0].device_kind.lower()
    except Exception:
        kind = ""
    if ("v5" in kind) or ("v6" in kind):
        return 128 << 20
    # v7x has 64 MiB per TensorCore; also the safe default for unknown chips.
    return 64 << 20


def _linear_kernel(x_ref, w_ref, b_ref, o_ref):
    # Single-K-tile fast path: no accumulator scratch, direct store.
    acc = lax.dot_general(
        x_ref[...],
        w_ref[...],
        dimension_numbers=(((1,), (1,)), ((), ())),  # contract hidden dim of both
        preferred_element_type=jnp.float32,
    )
    o_ref[...] = (acc + b_ref[...].astype(jnp.float32)).astype(o_ref.dtype)


def _linear_kernel_ktiled(x_ref, w_ref, b_ref, o_ref, acc_ref):
    # Fallback for enormous H: f32 accumulator across the (innermost) K axis.
    k = pl.program_id(2)

    @pl.when(k == 0)
    def _():
        acc_ref[...] = jnp.zeros_like(acc_ref)

    acc_ref[...] += lax.dot_general(
        x_ref[...],
        w_ref[...],
        dimension_numbers=(((1,), (1,)), ((), ())),
        preferred_element_type=jnp.float32,
    )

    @pl.when(k == pl.num_programs(2) - 1)
    def _():
        o_ref[...] = (acc_ref[...] + b_ref[...].astype(jnp.float32)).astype(o_ref.dtype)


@functools.partial(jax.jit, static_argnames=("tm", "tn"))
def output_embedding_forward(x, weight, bias, *, tm=256, tn=1024):
    """y = F.linear(x, weight, bias) == x @ weight.T + bias.

    x: [..., H], weight: [V, H], bias: [V]  ->  [..., V]
    """
    orig_shape = x.shape
    H = orig_shape[-1]
    V, Hw = weight.shape
    assert Hw == H
    assert bias.shape == (V,)

    x2d = x.reshape(-1, H)
    M = x2d.shape[0]
    out_dtype = x.dtype

    in_itemsize = jnp.dtype(x.dtype).itemsize
    w_itemsize = jnp.dtype(weight.dtype).itemsize
    b_itemsize = jnp.dtype(bias.dtype).itemsize
    out_itemsize = jnp.dtype(out_dtype).itemsize

    # ---- generation-aware VMEM budget ----
    vmem_cap = _vmem_capacity_bytes()
    usable = int(vmem_cap * 0.80)  # ~102 MiB on v5e/v6e, ~51 MiB on v7x

    def pipeline_bytes(tm_, tn_, tk_, with_acc):
        b = 2 * tm_ * tk_ * in_itemsize      # x tile (double-buffered)
        b += 2 * tn_ * tk_ * w_itemsize      # weight strip (double-buffered)
        b += 2 * tn_ * b_itemsize            # bias strip
        b += 2 * tm_ * tn_ * out_itemsize    # output tile
        if with_acc:
            b += tm_ * tn_ * 4               # f32 accumulator scratch
        return b

    # sublane multiple for the activation dtype (8 f32 / 16 bf16 / 32 int8)
    sub_mult = max(8, 32 // max(1, in_itemsize))

    # Decode / small-prefill: keep the whole x resident, drop the M grid axis.
    x_resident = (M * H * in_itemsize) <= min(8 << 20, usable // 8)
    tm_eff = M if x_resident else min(tm, _round_up(M, sub_mult))

    # ---- pick tn: the widest full-H vocab strip that fits the VMEM budget ----
    tn_eff = None
    cand = _round_up(min(tn, _round_up(V, 128)), 128)
    while cand >= 128:
        t = V if cand >= V else cand  # a full-dim block is always layout-legal
        if pipeline_bytes(tm_eff, t, H, with_acc=False) <= usable:
            tn_eff = t
            break
        if cand == 128:
            break
        cand = max(128, cand // 2)

    bias2d = bias.reshape(1, V)

    if tn_eff is not None:
        # ---------------- fast path: single K tile ----------------
        v_tiles = pl.cdiv(V, tn_eff)
        footprint = pipeline_bytes(tm_eff, tn_eff, H, with_acc=False)
        vmem_limit = int(min(usable, max(32 << 20, footprint + (8 << 20))))

        x_reads = 1 if x_resident else v_tiles
        cost = pl.CostEstimate(
            flops=2 * M * V * H,
            transcendentals=0,
            bytes_accessed=(
                x_reads * M * H * in_itemsize
                + V * H * w_itemsize
                + V * b_itemsize
                + M * V * out_itemsize
            ),
        )

        if x_resident:
            grid = (v_tiles,)
            in_specs = [
                pl.BlockSpec((M, H), lambda j: (0, 0)),        # x: DMA'd once, resident
                pl.BlockSpec((tn_eff, H), lambda j: (j, 0)),   # weight strip
                pl.BlockSpec((1, tn_eff), lambda j: (0, j)),   # bias strip
            ]
            out_specs = pl.BlockSpec((M, tn_eff), lambda j: (0, j))
            dims = ("parallel",)
        else:
            grid = (v_tiles, pl.cdiv(M, tm_eff))               # V outer, M inner
            in_specs = [
                pl.BlockSpec((tm_eff, H), lambda j, i: (i, 0)),
                pl.BlockSpec((tn_eff, H), lambda j, i: (j, 0)),  # reused across M tiles
                pl.BlockSpec((1, tn_eff), lambda j, i: (0, j)),
            ]
            out_specs = pl.BlockSpec((tm_eff, tn_eff), lambda j, i: (i, j))
            dims = ("parallel", "parallel")

        out = pl.pallas_call(
            _linear_kernel,
            out_shape=jax.ShapeDtypeStruct((M, V), out_dtype),
            grid_spec=pltpu.PrefetchScalarGridSpec(
                num_scalar_prefetch=0,
                grid=grid,
                in_specs=in_specs,
                out_specs=out_specs,
            ),
            compiler_params=pltpu.CompilerParams(
                dimension_semantics=dims,
                vmem_limit_bytes=vmem_limit,
            ),
            cost_estimate=cost,
        )(x2d, weight, bias2d)
    else:
        # ------- rare fallback: H so large no full-H strip fits even at tn=128 -------
        tm_kt = min(tm, _round_up(M, sub_mult))
        tn_kt = min(512, _round_up(V, 128))
        tk = usable // 4 // max(1, (tm_kt * in_itemsize + tn_kt * w_itemsize))
        tk = max(512, (tk // 128) * 128)
        tk = min(tk, _round_up(H, 128))
        H_pad = _round_up(H, tk)

        # Reduction dim must be explicitly zero-padded (OOB garbage would corrupt
        # valid outputs); M/V stay un-padded and rely on boundary masking.
        x_p = jnp.pad(x2d, ((0, 0), (0, H_pad - H))) if H_pad != H else x2d
        w_p = jnp.pad(weight, ((0, 0), (0, H_pad - H))) if H_pad != H else weight

        v_tiles = pl.cdiv(V, tn_kt)
        m_tiles = pl.cdiv(M, tm_kt)
        grid = (v_tiles, m_tiles, H_pad // tk)

        footprint = pipeline_bytes(tm_kt, tn_kt, tk, with_acc=True)
        vmem_limit = int(min(usable, max(32 << 20, footprint + (8 << 20))))

        cost = pl.CostEstimate(
            flops=2 * M * V * H,
            transcendentals=0,
            bytes_accessed=(
                v_tiles * M * H_pad * in_itemsize
                + m_tiles * V * H_pad * w_itemsize
                + V * b_itemsize
                + M * V * out_itemsize
            ),
        )

        out = pl.pallas_call(
            _linear_kernel_ktiled,
            out_shape=jax.ShapeDtypeStruct((M, V), out_dtype),
            grid_spec=pltpu.PrefetchScalarGridSpec(
                num_scalar_prefetch=0,
                grid=grid,
                in_specs=[
                    pl.BlockSpec((tm_kt, tk), lambda j, i, k: (i, k)),
                    pl.BlockSpec((tn_kt, tk), lambda j, i, k: (j, k)),
                    pl.BlockSpec((1, tn_kt), lambda j, i, k: (0, j)),
                ],
                out_specs=pl.BlockSpec((tm_kt, tn_kt), lambda j, i, k: (i, j)),
                scratch_shapes=[pltpu.VMEM((tm_kt, tn_kt), jnp.float32)],
            ),
            compiler_params=pltpu.CompilerParams(
                dimension_semantics=("parallel", "parallel", "arbitrary"),
                vmem_limit_bytes=vmem_limit,
            ),
            cost_estimate=cost,
        )(x_p, w_p, bias2d)

    return out.reshape(*orig_shape[:-1], V)


if __name__ == "__main__":
    key = jax.random.PRNGKey(0)
    k1, k2, k3, k4, k5, k6, k7, k8, k9 = jax.random.split(key, 9)

    # --- test 1: small shapes consistent with the module (batch=2, seq=8, hidden=32, vocab=64)
    B, S, H, V = 2, 8, 32, 64
    x = jax.random.normal(k1, (B, S, H), dtype=jnp.float32)
    weight = jax.random.normal(k2, (V, H), dtype=jnp.float32) * 0.02
    bias = jax.random.normal(k3, (V,), dtype=jnp.float32) * 0.02

    y = jax.block_until_ready(output_embedding_forward(x, weight, bias))
    ref = x @ weight.T + bias
    assert y.shape == (B, S, V)
    assert jnp.allclose(y, ref, atol=1e-5, rtol=1e-5)

    # --- test 2: unaligned dims; exercises boundary masking without any padding copies
    B2, S2, H2, V2 = 3, 5, 128, 384
    x2 = jax.random.normal(k4, (B2, S2, H2), dtype=jnp.float32)
    w2 = jax.random.normal(k5, (V2, H2), dtype=jnp.float32) * 0.02
    b2 = jax.random.normal(k6, (V2,), dtype=jnp.float32) * 0.02

    y2 = jax.block_until_ready(output_embedding_forward(x2, w2, b2))
    ref2 = x2 @ w2.T + b2
    assert y2.shape == (B2, S2, V2)
    assert jnp.allclose(y2, ref2, atol=1e-4, rtol=1e-4)

    # --- test 3: larger M/V forcing the tiled (non-x-resident) path with partial
    #     last tiles in both M and V (masked boundary stores).
    M3, H3, V3 = 2100, 1024, 1100
    x3 = jax.random.normal(k7, (M3, H3), dtype=jnp.float32)
    w3 = jax.random.normal(k8, (V3, H3), dtype=jnp.float32) * 0.02
    b3 = jax.random.normal(k9, (V3,), dtype=jnp.float32) * 0.02

    y3 = jax.block_until_ready(output_embedding_forward(x3, w3, b3))
    ref3 = x3 @ w3.T + b3
    assert y3.shape == (M3, V3)
    assert jnp.allclose(y3, ref3, atol=5e-3, rtol=5e-3)

    print("KERNEL_OK")
</pallas_src>

<mosaic_0001>
module attributes {stable_mosaic.version = 11 : i64} {
  func.func @_linear_kernel(%arg0: i32, %arg1: memref<16x32xf32, #tpu.memory_space<vmem>>, %arg2: memref<64x32xf32, #tpu.memory_space<vmem>>, %arg3: memref<1x64xf32, #tpu.memory_space<vmem>>, %arg4: memref<16x64xf32, #tpu.memory_space<vmem>>) attributes {dimension_semantics = [#tpu.dimension_semantics<parallel>], iteration_bounds = array<i64: 1>, scalar_prefetch = 0 : i64, scratch_operands = 0 : i64, tpu.core_type = #tpu.core_type<tc>, window_params = [{pipeline_mode = #tpu.pipeline_mode<synchronous>, transform_indices = @transform_0, window_bounds = array<i64: 16, 32>}, {transform_indices = @transform_1, window_bounds = array<i64: 64, 32>}, {transform_indices = @transform_2, window_bounds = array<i64: 1, 64>}, {transform_indices = @transform_3, window_bounds = array<i64: 16, 64>}]} {
    %c0 = arith.constant 0 : index
    %c0_0 = arith.constant 0 : index
    %0 = vector.load %arg1[%c0, %c0_0] : memref<16x32xf32, #tpu.memory_space<vmem>>, vector<16x32xf32>
    %c0_1 = arith.constant 0 : index
    %c0_2 = arith.constant 0 : index
    %1 = vector.load %arg2[%c0_1, %c0_2] : memref<64x32xf32, #tpu.memory_space<vmem>>, vector<64x32xf32>
    %cst = arith.constant dense<0.000000e+00> : vector<16x64xf32>
    %2 = tpu.matmul %0, %1, %cst {dimension_numbers = #tpu.dot_dimension_numbers<[1], [1], [0], [0], [0, 0, 1, 0], [], []>} : vector<16x32xf32>, vector<64x32xf32>, vector<16x64xf32> -> vector<16x64xf32>
    %c0_3 = arith.constant 0 : index
    %c0_4 = arith.constant 0 : index
    %3 = vector.load %arg3[%c0_3, %c0_4] : memref<1x64xf32, #tpu.memory_space<vmem>>, vector<1x64xf32>
    %4 = vector.broadcast %3 : vector<1x64xf32> to vector<16x64xf32>
    %5 = arith.addf %2, %4 : vector<16x64xf32>
    %c0_5 = arith.constant 0 : index
    %c0_6 = arith.constant 0 : index
    %6 = vector.load %arg4[%c0_5, %c0_6] : memref<16x64xf32, #tpu.memory_space<vmem>>, vector<16x64xf32>
    tpu.vector_store %arg4[%c0_5, %c0_6], %5 {strides = array<i32>} : memref<16x64xf32, #tpu.memory_space<vmem>>, vector<16x64xf32>,
    return
  }
  func.func @transform_0(%arg0: i32) -> (i32, i32) {
    %c0_i32 = arith.constant 0 : i32
    %c0_i32_0 = arith.constant 0 : i32
    %c0_i32_1 = arith.constant 0 : i32
    return %c0_i32, %c0_i32_0 : i32, i32
  }
  func.func @transform_1(%arg0: i32) -> (i32, i32) {
    %c0_i32 = arith.constant 0 : i32
    %c0_i32_0 = arith.constant 0 : i32
    return %arg0, %c0_i32 : i32, i32
  }
  func.func @transform_2(%arg0: i32) -> (i32, i32) {
    %c0_i32 = arith.constant 0 : i32
    %c0_i32_0 = arith.constant 0 : i32
    return %c0_i32, %arg0 : i32, i32
  }
  func.func @transform_3(%arg0: i32) -> (i32, i32) {
    %c0_i32 = arith.constant 0 : i32
    %c0_i32_0 = arith.constant 0 : i32
    return %c0_i32, %arg0 : i32, i32
  }
}

</mosaic_0001>

<bundles_post_ra>
// kernel: output_embedding_forward.1
= control target key start
LH: loop header
LB: loop body
LE: loop exit
PB: predicated region body
PF: predicated region fallthrough
CT: control target
= control target key end

     0   :  { %vm32_vm0 = vcmask 261120   ;;  %s299_s0 = inlined_call_operand.vmem [shape: f32[16,32], index: 0, kind: input, shape index: {}]   ;;  %s300_s1 = inlined_call_operand.vmem [shape: f32[64,32], index: 1, kind: input, shape index: {}]   ;;  %s301_s2 = inlined_call_operand.vmem [shape: f32[1,64], index: 2, kind: input, shape index: {}]   ;;  %s302_s3 = inlined_call_operand.hbm [shape: f32[16,64], index: 3, kind: output, shape index: {}]  }
   0x1   :  { %v24_v0 = vld [vmem:[%s300_s1 + $0x38] sm:$0xff]  ;;  %v23_v1 = vld [vmem:[%s300_s1 + $0x30] sm:$0xff]  ;;  %v15_v2 = vld [vmem:[%s299_s0] sm:$0xff] }
   0x2   :  { %178 = vmatprep.subr.msk.mxu0 %vm32_vm0, %v24_v0  ;;  %194 = vmatprep.mubr.msk.f32.mxu0 %vm32_vm0, %v15_v2 }
   0x3   :  { %179 = vmatpush3.xpose.msk.msra.mxu0 %vm32_vm0, %v24_v0 }
   0x4   :  { %180 = vmatprep.subr.msk.mxu0 %vm32_vm0, %v23_v1 }
   0x5   :  { %8 = vsyncpa [#allocation3], 0  ;;  %v22_v3 = vld [vmem:[%s300_s1 + $0x28] sm:$0xff]  ;;  %v21_v4 = vld [vmem:[%s300_s1 + $0x20] sm:$0xff]  ;;  %s222_s7 = smov [#allocation2]   ;;  %vm138_vm1 = vcmask 523264  }
   0x6   :  { %v20_v5 = vld [vmem:[%s300_s1 + $0x18] sm:$0xff]  ;;  %v19_v6 = vld [vmem:[%s300_s1 + $0x10] sm:$0xff]  ;;  %v18_v7 = vld [vmem:[%s300_s1 + $0x8] sm:$0xff]  ;;  %s146_s8 = sshll.u32 %s222_s7, 4  ;;  %s147_s8 = int_to_ptr.vmem [resolvable:$true] %s146_s8 }
   0x7   :  { %181 = vmatpush3.xpose.msk.msra.mxu0 %vm32_vm0, %v23_v1  ;;  %v17_v8 = vld [vmem:[%s300_s1] sm:$0xff]  ;;  %v16_v9 = vld [vmem:[%s299_s0 + $0x8] sm:$0xff]  ;;  %s200_s1 = scalar_lea.vmem %s147_s8, 256  ;;  %p205_p1 = scmp.lt.s32.totalorder %s147_s8, %s147_s8 }
   0x8   :  { %182 = vmatprep.subr.msk.mxu0 %vm32_vm0, %v22_v3  ;;  %v157_v10 = vld [vmem:[%s301_s2] ss:$0 sm:$0xff]  ;;  %p201_p0 = scmp.ne.s32.totalorder %s147_s8, %s200_s1  ;;  %p206_p2 = scmp.lt.s32.totalorder %s200_s1, %s200_s1 }
   0xa   :  { %p207_p3 = por %p206_p2, %p205_p1 }
   0xb   :  { %183 = vmatpush3.xpose.msk.msra.mxu0 %vm32_vm0, %v22_v3 }
   0xc   :  { %184 = vmatprep.subr.msk.mxu0 %vm32_vm0, %v21_v4  ;;  %p208_p4 = pnand %p207_p3, %p201_p0 }
   0xf   :  { %185 = vmatpush3.xpose.msk.msra.mxu0 %vm32_vm0, %v21_v4 }
  0x10   :  { %186 = vmatprep.subr.msk.mxu0 %vm32_vm0, %v20_v5 }
  0x13   :  { %187 = vmatpush3.xpose.msk.msra.mxu0 %vm32_vm0, %v20_v5 }
  0x14   :  { %188 = vmatprep.subr.msk.mxu0 %vm32_vm0, %v19_v6 }
  0x17   :  { %189 = vmatpush3.xpose.msk.msra.mxu0 %vm32_vm0, %v19_v6 }
  0x18   :  { %190 = vmatprep.subr.msk.mxu0 %vm32_vm0, %v18_v7 }
  0x1b   :  { %191 = vmatpush3.xpose.msk.msra.mxu0 %vm32_vm0, %v18_v7 }
  0x1c   :  { %192 = vmatprep.subr.msk.mxu0 %vm32_vm0, %v17_v8 }
  0x1f   :  { %193 = vmatpush3.xpose.msk.msra.mxu0 %vm32_vm0, %v17_v8 }
  0x22   :  { %195 = vmatmul.mubr.msk.f32.vlgmr.msra.gmra.mxu0 %vm32_vm0, %v16_v9 }
  0xe2   :  { %v196_v11 = vpop.f32.mrf.mxu0 }
  0xe3   :  { %v135_v12 = vadd.f32 %v196_v11, %v157_v10 }
  0xe4   :  { %v129_v13 = vpop.f32.mrf.mxu0 }
  0xe5   :  { %140 = vst.msk [vmem:[#allocation2 + $0x8] sm:$0xff] %vm138_vm1, %v135_v12  ;;  %v130_v14 = vadd.f32 %v157_v10, %v129_v13 }
  0xe7   :  { %139 = vst.msk [vmem:[#allocation2] sm:$0xff] %vm138_vm1, %v130_v14 }
  0xe8   :  { %211 = shalt.err (!%p208_p4)
}
  0xe9   :  { %s223_s0 = smov 128   ;;  %s224_s9 = smov 8  }
  0xea   :  { %152 = dma.vmem_to_hbm [thread:$0]  %s147_s8, 256, %s302_s3, [#allocation3], %s223_s0, %s223_s0, %s224_s9  }
  0xeb   :  { %220 = dma.done.wait [#allocation3], 256  }
  0xec   :  { %221 = vsyncadd [#allocation3], 4294967040 }
  0xed   :  { %156 = vsyncpa [#allocation3], 1 }

</bundles_post_ra>
